<compile_context>
chip_gen: v6e
topology: v6e:2x2x1
jax: 0.10.0
libtpu: 0.0.40
codegen_flags: <defaults>
</compile_context>

<pallas_src>
import jax
import jax.numpy as jnp
from jax.experimental import pallas as pl
from jax.experimental.pallas import tpu as pltpu


def _round_up(x, m):
    return ((x + m - 1) // m) * m


def _vmem_capacity_bytes():
    """Per-TensorCore VMEM capacity; conservative 64 MiB fallback (v7x) if unqueryable."""
    cap = 64 * 1024 * 1024
    try:
        info = pltpu.get_tpu_info()
        cap = int(getattr(info, "vmem_capacity_bytes", cap)) or cap
    except Exception:
        pass
    return cap


def _plan_tiles(n_layers, hidden_size, s_pad, n_out_pad, n_pieces, act_bytes=2):
    """Largest packed-piece tile (multiple of 128) whose per-step VMEM footprint fits a
    generation-aware budget; also returns the vmem_limit_bytes to hand the compiler."""
    cap = _vmem_capacity_bytes()
    target = min(int(cap * 0.70), cap - (8 << 20))
    # Per-grid-step VMEM that does NOT scale with the piece tile.
    fixed = (2 * s_pad * 4                       # 1/len (double-buffered)
             + s_pad * hidden_size * 4           # acc scratch (resident)
             + s_pad * hidden_size * 4           # pooled temporary at finalize
             + 2 * s_pad * n_out_pad * 4         # output block (double-buffered)
             + 2 * hidden_size * n_out_pad * 4)  # resident projection weight
    # VMEM per packed piece in the tile.
    per_piece = (2 * n_layers * hidden_size * act_bytes   # hidden block (double-buffered)
                 + n_layers * hidden_size * act_bytes     # flattened-hidden copy margin
                 + n_layers * s_pad * act_bytes           # segw (mix-folded one-hot)
                 + 2 * s_pad * act_bytes                  # one-hot + compare temporaries
                 + 2 * 4)                                 # word ids (double-buffered)
    tlp = (target - fixed) // per_piece
    tlp = max(128, (tlp // 128) * 128)
    tlp = min(tlp, 2048, _round_up(n_pieces, 128))
    est = fixed + per_piece * tlp
    vmem_limit = int(min(cap * 0.75, max(est * 5 // 4, 32 << 20)))
    vmem_limit = min(max(vmem_limit, est), cap)
    return int(tlp), int(vmem_limit)


# ---------------------------------------------------------------------------
# Fused kernel: ScalarMix (folded into MXU) + sub-word pooling + mean + projection
# ---------------------------------------------------------------------------
def _fused_kernel(mixw_ref, wid_ref, invl_ref, h_ref, pw_ref, o_ref, acc_ref):
    # mixw_ref : SMEM (L,)  f32            gamma * softmax(scalar_parameters)
    # wid_ref  : VMEM (1, TLP) int32       word id of each packed piece (-1 for padding)
    # invl_ref : VMEM (S_pad, 1) f32       1 / max(bert_lens, 1)
    # h_ref    : VMEM (L, TLP, H) bf16     hidden states for this (batch, piece tile)
    # pw_ref   : VMEM (H, n_out_pad) f32   projection weight, zero-padded to 128 lanes
    # o_ref    : VMEM (S_pad, n_out_pad) f32
    # acc_ref  : VMEM (S_pad, H) f32       pooled-sum accumulator, resident across piece tiles
    k = pl.program_id(1)

    @pl.when(k == 0)
    def _():
        acc_ref[...] = jnp.zeros_like(acc_ref)

    n_layers, tlp, _ = h_ref.shape
    s_pad = acc_ref.shape[0]

    # 1) bf16 one-hot in natural (S_pad, TLP) orientation; the iota is only (S_pad, 1).
    iota_s = jax.lax.broadcasted_iota(jnp.int32, (s_pad, 1), 0)
    onehot = (iota_s == wid_ref[...]).astype(jnp.bfloat16)          # (S_pad, TLP)

    # 2) Fold the ScalarMix layer weights into the one-hot (0/1 values stay exact), then
    #    ONE bf16 MXU matmul with f32 accumulation does mix + scatter + sub-word sum.
    parts = [mixw_ref[l].astype(jnp.bfloat16) * onehot for l in range(n_layers)]
    segw = parts[0] if n_layers == 1 else jnp.concatenate(parts, axis=-1)  # (S_pad, L*TLP)
    h_flat = h_ref[...].reshape(n_layers * tlp, h_ref.shape[2])            # free collapse
    acc_ref[...] += jnp.dot(segw, h_flat, preferred_element_type=jnp.float32)

    # 3) Finalize this batch: mean via precomputed reciprocal (multiply) + projection.
    @pl.when(k == pl.num_programs(1) - 1)
    def _():
        pooled = acc_ref[...] * invl_ref[...]                      # (S_pad, H)
        o_ref[...] = jnp.dot(pooled, pw_ref[...],
                             preferred_element_type=jnp.float32).astype(o_ref.dtype)


def fused_mix_pool_project(mix_w, word_id, inv_len, hidden, proj_w, *,
                           piece_tile, vmem_limit):
    """mix_w: (L,) f32, word_id: (B, 1, Lp_pad) i32, inv_len: (B, S_pad, 1) f32,
       hidden: (B, L, Lp_pad, H) bf16, proj_w: (H, n_out_pad) f32
       -> (B, S_pad, n_out_pad) f32."""
    B, L, Lp_pad, H = hidden.shape
    S_pad = inv_len.shape[1]
    n_out_pad = proj_w.shape[1]
    TLP = piece_tile
    assert Lp_pad % TLP == 0 and TLP % 128 == 0
    K = Lp_pad // TLP

    return pl.pallas_call(
        _fused_kernel,
        out_shape=jax.ShapeDtypeStruct((B, S_pad, n_out_pad), jnp.float32),
        grid=(B, K),
        in_specs=[
            pl.BlockSpec(memory_space=pltpu.MemorySpace.SMEM),              # mix weights
            pl.BlockSpec((None, 1, TLP), lambda b, k: (b, 0, k)),           # word ids
            pl.BlockSpec((None, S_pad, 1), lambda b, k: (b, 0, 0)),         # 1/len
            pl.BlockSpec((None, L, TLP, H), lambda b, k: (b, 0, k, 0)),     # hidden states
            pl.BlockSpec((H, n_out_pad), lambda b, k: (0, 0)),              # proj_w (resident)
        ],
        out_specs=pl.BlockSpec((None, S_pad, n_out_pad), lambda b, k: (b, 0, 0)),
        scratch_shapes=[pltpu.VMEM((S_pad, H), jnp.float32)],
        compiler_params=pltpu.CompilerParams(
            dimension_semantics=("parallel", "arbitrary"),
            vmem_limit_bytes=int(vmem_limit)),
    )(mix_w, word_id, inv_len, hidden, proj_w)


# ---------------------------------------------------------------------------
# Synthetic deterministic "BERT" stand-in (glue, plain JAX)
# ---------------------------------------------------------------------------
def synthetic_bert_hidden_states(token_ids, params, n_layers):
    """token_ids: (B, Lp) int32 -> hidden states (B, n_layers + 1, Lp, H), float32."""
    h = params["embedding"][token_ids]                       # (B, Lp, H)
    hiddens = [h]
    for l in range(n_layers):
        h = jnp.tanh(h @ params["layer_w"][l])
        hiddens.append(h)
    return jnp.stack(hiddens, 1)                             # (B, L+1, Lp, H)


# ---------------------------------------------------------------------------
# Full forward (mirrors BertEmbedding.forward)
# ---------------------------------------------------------------------------
def bert_embedding_forward(subwords, params, n_layers, pad_index=0):
    B, S, F = subwords.shape
    Lp = S * F
    flat = subwords.reshape(B, Lp)
    mask_flat = flat != pad_index                                   # [B, Lp]

    # --- pack non-pad pieces to the front per batch (pad_sequence equivalent)
    sort_key = (~mask_flat).astype(jnp.int32) * Lp + jnp.arange(Lp)[None, :]
    order = jnp.argsort(sort_key, axis=1)                           # stable
    packed = jnp.take_along_axis(flat, order, axis=1)               # [B, Lp]
    packed_mask = jnp.take_along_axis(mask_flat, order, axis=1)     # [B, Lp]
    # word id of every packed piece; -1 on the padded tail (pooled into no word)
    word_id = jnp.where(packed_mask, order // F, -1).astype(jnp.int32)

    # --- tile / pad sizes (lane-dense output, MXU-friendly piece axis)
    H = params["embedding"].shape[1]
    proj_w = params["proj_w"]           # NOTE: if hidden_size == n_out, pass identity here
    n_out = proj_w.shape[1]
    S_pad = _round_up(S, 8)
    n_out_pad = _round_up(n_out, 128)
    TLP, vmem_limit = _plan_tiles(n_layers, H, S_pad, n_out_pad, Lp)
    Lp_pad = _round_up(Lp, TLP)

    packed = jnp.pad(packed, ((0, 0), (0, Lp_pad - Lp)), constant_values=pad_index)
    word_id = jnp.pad(word_id, ((0, 0), (0, Lp_pad - Lp)), constant_values=-1)

    # --- "BERT" hidden states (stand-in; seq < max_len so the stride loop never runs)
    hs = synthetic_bert_hidden_states(packed, params, n_layers)[:, -n_layers:]
    hs = hs.astype(jnp.bfloat16)        # stream activations at half the HBM traffic
    # TODO(synk): on v7x the hidden stream could be fp8 with the per-layer scale folded
    #             into mix_w; not done here (v5e/v6e MXUs lack fp8 and precision differs).

    # --- remaining scalar glue feeding the fused kernel
    mix_w = (params["gamma"] * jax.nn.softmax(params["scalar_params"])).astype(jnp.float32)
    bert_lens = mask_flat.reshape(B, S, F).sum(-1)                  # [B, S]
    inv_len = 1.0 / jnp.maximum(bert_lens, 1).astype(jnp.float32)
    inv_len = jnp.pad(inv_len, ((0, 0), (0, S_pad - S)), constant_values=1.0)
    proj_w_pad = jnp.pad(proj_w.astype(jnp.float32), ((0, 0), (0, n_out_pad - n_out)))

    out = fused_mix_pool_project(
        mix_w, word_id[:, None, :], inv_len[..., None], hs, proj_w_pad,
        piece_tile=TLP, vmem_limit=vmem_limit)                      # [B, S_pad, n_out_pad]

    seq_attn = None  # use_attentions=False
    return out[:, :S, :n_out], seq_attn


# ---------------------------------------------------------------------------
# Pure-JAX reference (same math, no Pallas) for correctness check
# ---------------------------------------------------------------------------
def reference_forward(subwords, params, n_layers, pad_index=0):
    B, S, F = subwords.shape
    Lp = S * F
    flat = subwords.reshape(B, Lp)
    mask_flat = flat != pad_index
    sort_key = (~mask_flat).astype(jnp.int32) * Lp + jnp.arange(Lp)[None, :]
    order = jnp.argsort(sort_key, axis=1)
    packed = jnp.take_along_axis(flat, order, axis=1)

    hs = synthetic_bert_hidden_states(packed, params, n_layers)[:, -n_layers:]
    hs = hs.astype(jnp.bfloat16).astype(jnp.float32)     # same activation precision policy
    mix_w = params["gamma"] * jax.nn.softmax(params["scalar_params"])
    bert = jnp.einsum("l,blnh->bnh", mix_w, hs,
                      precision=jax.lax.Precision.HIGHEST)

    idx = jnp.clip(jnp.cumsum(mask_flat.astype(jnp.int32), axis=1) - 1, 0, Lp - 1)
    gathered = jnp.take_along_axis(bert, idx[..., None], axis=1)
    embed = jnp.where(mask_flat[..., None], gathered, 0.0).reshape(B, S, F, -1)

    bert_lens = jnp.maximum(mask_flat.reshape(B, S, F).sum(-1), 1).astype(jnp.float32)
    pooled = embed.sum(2) / bert_lens[..., None]
    out = jnp.einsum("bsh,ho->bso", pooled, params["proj_w"],
                     precision=jax.lax.Precision.HIGHEST)
    return out, None


# ---------------------------------------------------------------------------
if __name__ == "__main__":
    B, S, F = 2, 8, 4          # batch, seq_len, fix_len
    H, n_out = 32, 16          # hidden_size, n_out  (projection active: H != n_out)
    n_layers = 4
    vocab = 64
    pad_index = 0

    key = jax.random.PRNGKey(0)
    k_emb, k_layers, k_proj, k_tok, k_len = jax.random.split(key, 5)

    params = {
        "embedding": (jax.random.normal(k_emb, (vocab, H), jnp.float32) * 0.1),
        "layer_w": (jax.random.normal(k_layers, (n_layers, H, H), jnp.float32)
                    / jnp.sqrt(jnp.float32(H))),
        # ScalarMix defaults: scalar params init to 0, gamma init to 1
        "scalar_params": jnp.zeros((n_layers,), jnp.float32),
        "gamma": jnp.float32(1.0),
        # nn.Linear(hidden, n_out, bias=False) weight, stored transposed as (H, n_out)
        "proj_w": (jax.random.normal(k_proj, (H, n_out), jnp.float32) * 0.1),
    }

    # Build subwords: each (b, s) word has 1..F sub-word pieces, rest padded with 0;
    # include fully-padded word slots to exercise the bert_lens clamp.
    word_len = jax.random.randint(k_len, (B, S), 1, F + 1)
    word_len = word_len.at[1, 6:].set(0)
    tok = jax.random.randint(k_tok, (B, S, F), 1, vocab)
    piece_pos = jnp.arange(F)[None, None, :]
    subwords = jnp.where(piece_pos < word_len[..., None], tok, pad_index).astype(jnp.int32)

    out, seq_attn = bert_embedding_forward(subwords, params, n_layers, pad_index)
    out = jax.block_until_ready(out)

    ref, _ = reference_forward(subwords, params, n_layers, pad_index)
    assert out.shape == (B, S, n_out), out.shape
    assert seq_attn is None
    err = float(jnp.max(jnp.abs(out - ref)))
    assert jnp.allclose(out, ref, atol=2e-4, rtol=2e-4), err

    print("KERNEL_OK")
</pallas_src>

<mosaic_0001>
module attributes {stable_mosaic.version = 11 : i64} {
  func.func @_fused_kernel(%arg0: i32, %arg1: i32, %arg2: memref<4xf32, #tpu.memory_space<smem>>, %arg3: memref<1x1x128xi32, #tpu.memory_space<vmem>>, %arg4: memref<1x8x1xf32, #tpu.memory_space<vmem>>, %arg5: memref<1x4x128x32xbf16, #tpu.memory_space<vmem>>, %arg6: memref<32x128xf32, #tpu.memory_space<vmem>>, %arg7: memref<1x8x128xf32, #tpu.memory_space<vmem>>, %arg8: memref<8x32xf32, #tpu.memory_space<vmem>>) attributes {dimension_semantics = [#tpu.dimension_semantics<parallel>, #tpu.dimension_semantics<arbitrary>], iteration_bounds = array<i64: 2, 1>, scalar_prefetch = 0 : i64, scratch_operands = 1 : i64, tpu.core_type = #tpu.core_type<tc>, window_params = [{transform_indices = @transform_0, window_bounds = array<i64: 4>}, {transform_indices = @transform_1, window_bounds = array<i64: 1, 1, 128>}, {transform_indices = @transform_2, window_bounds = array<i64: 1, 8, 1>}, {transform_indices = @transform_3, window_bounds = array<i64: 1, 4, 128, 32>}, {pipeline_mode = #tpu.pipeline_mode<synchronous>, transform_indices = @transform_4, window_bounds = array<i64: 32, 128>}, {transform_indices = @transform_5, window_bounds = array<i64: 1, 8, 128>}]} {
    %c0_i32 = arith.constant 0 : i32
    %0 = arith.cmpi eq, %arg1, %c0_i32 : i32
    %1 = arith.extui %0 : i1 to i32
    %c0_i32_0 = arith.constant 0 : i32
    %2 = arith.cmpi ne, %1, %c0_i32_0 : i32
    scf.if %2 {
      %cst_14 = arith.constant 0.000000e+00 : f32
      %39 = vector.broadcast %cst_14 : f32 to vector<8x32xf32>
      %c0_15 = arith.constant 0 : index
      %c0_16 = arith.constant 0 : index
      %40 = vector.load %arg8[%c0_15, %c0_16] : memref<8x32xf32, #tpu.memory_space<vmem>>, vector<8x32xf32>
      tpu.vector_store %arg8[%c0_15, %c0_16], %39 {strides = array<i32>} : memref<8x32xf32, #tpu.memory_space<vmem>>, vector<8x32xf32>,
    } else {
    }
    %3 = tpu.iota {dimensions = array<i32: 0>} : vector<8x1xi32>
    %c0 = arith.constant 0 : index
    %c0_1 = arith.constant 0 : index
    %c0_2 = arith.constant 0 : index
    %4 = vector.load %arg3[%c0, %c0_1, %c0_2] : memref<1x1x128xi32, #tpu.memory_space<vmem>>, vector<1x1x128xi32>
    %5 = vector.shape_cast %4 : vector<1x1x128xi32> to vector<1x128xi32>
    %6 = vector.broadcast %3 : vector<8x1xi32> to vector<8x128xi32>
    %7 = vector.broadcast %5 : vector<1x128xi32> to vector<8x128xi32>
    %8 = arith.cmpi eq, %6, %7 : vector<8x128xi32>
    %9 = arith.extui %8 : vector<8x128xi1> to vector<8x128xi32>
    %10 = arith.sitofp %9 : vector<8x128xi32> to vector<8x128xf32>
    %11 = arith.truncf %10 : vector<8x128xf32> to vector<8x128xbf16>
    %c0_3 = arith.constant 0 : index
    %12 = memref.load %arg2[%c0_3] : memref<4xf32, #tpu.memory_space<smem>>
    %13 = arith.truncf %12 : f32 to bf16
    %14 = vector.broadcast %13 : bf16 to vector<8x128xbf16>
    %15 = arith.mulf %14, %11 : vector<8x128xbf16>
    %c1 = arith.constant 1 : index
    %16 = memref.load %arg2[%c1] : memref<4xf32, #tpu.memory_space<smem>>
    %17 = arith.truncf %16 : f32 to bf16
    %18 = vector.broadcast %17 : bf16 to vector<8x128xbf16>
    %19 = arith.mulf %18, %11 : vector<8x128xbf16>
    %c2 = arith.constant 2 : index
    %20 = memref.load %arg2[%c2] : memref<4xf32, #tpu.memory_space<smem>>
    %21 = arith.truncf %20 : f32 to bf16
    %22 = vector.broadcast %21 : bf16 to vector<8x128xbf16>
    %23 = arith.mulf %22, %11 : vector<8x128xbf16>
    %c3 = arith.constant 3 : index
    %24 = memref.load %arg2[%c3] : memref<4xf32, #tpu.memory_space<smem>>
    %25 = arith.truncf %24 : f32 to bf16
    %26 = vector.broadcast %25 : bf16 to vector<8x128xbf16>
    %27 = arith.mulf %26, %11 : vector<8x128xbf16>
    %28 = tpu.concatenate %15, %19, %23, %27 in 1 : vector<8x128xbf16>, vector<8x128xbf16>, vector<8x128xbf16>, vector<8x128xbf16> -> vector<8x512xbf16>
    %c0_4 = arith.constant 0 : index
    %c0_5 = arith.constant 0 : index
    %c0_6 = arith.constant 0 : index
    %c0_7 = arith.constant 0 : index
    %29 = vector.load %arg5[%c0_4, %c0_5, %c0_6, %c0_7] : memref<1x4x128x32xbf16, #tpu.memory_space<vmem>>, vector<1x4x128x32xbf16>
    %30 = vector.shape_cast %29 : vector<1x4x128x32xbf16> to vector<4x128x32xbf16>
    %31 = vector.shape_cast %30 : vector<4x128x32xbf16> to vector<512x32xbf16>
    %c0_8 = arith.constant 0 : index
    %c0_9 = arith.constant 0 : index
    %32 = vector.load %arg8[%c0_8, %c0_9] : memref<8x32xf32, #tpu.memory_space<vmem>>, vector<8x32xf32>
    %cst = arith.constant dense<0.000000e+00> : vector<8x32xf32>
    %33 = tpu.matmul %28, %31, %cst {dimension_numbers = #tpu.dot_dimension_numbers<[1], [0], [0], [1], [0, 0, 1, 1], [], []>} : vector<8x512xbf16>, vector<512x32xbf16>, vector<8x32xf32> -> vector<8x32xf32>
    %34 = arith.addf %32, %33 : vector<8x32xf32>
    %c0_10 = arith.constant 0 : index
    %c0_11 = arith.constant 0 : index
    %35 = vector.load %arg8[%c0_10, %c0_11] : memref<8x32xf32, #tpu.memory_space<vmem>>, vector<8x32xf32>
    tpu.vector_store %arg8[%c0_10, %c0_11], %34 {strides = array<i32>} : memref<8x32xf32, #tpu.memory_space<vmem>>, vector<8x32xf32>,
    %c0_i32_12 = arith.constant 0 : i32
    %36 = arith.cmpi eq, %arg1, %c0_i32_12 : i32
    %37 = arith.extui %36 : i1 to i32
    %c0_i32_13 = arith.constant 0 : i32
    %38 = arith.cmpi ne, %37, %c0_i32_13 : i32
    scf.if %38 {
      %c0_14 = arith.constant 0 : index
      %c0_15 = arith.constant 0 : index
      %39 = vector.load %arg8[%c0_14, %c0_15] : memref<8x32xf32, #tpu.memory_space<vmem>>, vector<8x32xf32>
      %c0_16 = arith.constant 0 : index
      %c0_17 = arith.constant 0 : index
      %c0_18 = arith.constant 0 : index
      %40 = vector.load %arg4[%c0_16, %c0_17, %c0_18] : memref<1x8x1xf32, #tpu.memory_space<vmem>>, vector<1x8x1xf32>
      %41 = vector.shape_cast %40 : vector<1x8x1xf32> to vector<8x1xf32>
      %42 = vector.broadcast %41 : vector<8x1xf32> to vector<8x32xf32>
      %43 = arith.mulf %39, %42 : vector<8x32xf32>
      %c0_19 = arith.constant 0 : index
      %c0_20 = arith.constant 0 : index
      %44 = vector.load %arg6[%c0_19, %c0_20] : memref<32x128xf32, #tpu.memory_space<vmem>>, vector<32x128xf32>
      %cst_21 = arith.constant dense<0.000000e+00> : vector<8x128xf32>
      %45 = tpu.matmul %43, %44, %cst_21 {dimension_numbers = #tpu.dot_dimension_numbers<[1], [0], [0], [1], [0, 0, 1, 1], [], []>} : vector<8x32xf32>, vector<32x128xf32>, vector<8x128xf32> -> vector<8x128xf32>
      %c0_22 = arith.constant 0 : index
      %c0_23 = arith.constant 0 : index
      %c0_24 = arith.constant 0 : index
      %46 = vector.load %arg7[%c0_22, %c0_23, %c0_24] : memref<1x8x128xf32, #tpu.memory_space<vmem>>, vector<1x8x128xf32>
      %47 = vector.shape_cast %46 : vector<1x8x128xf32> to vector<8x128xf32>
      %48 = vector.shape_cast %45 : vector<8x128xf32> to vector<1x8x128xf32>
      tpu.vector_store %arg7[%c0_22, %c0_23, %c0_24], %48 {strides = array<i32>} : memref<1x8x128xf32, #tpu.memory_space<vmem>>, vector<1x8x128xf32>,
    } else {
    }
    return
  }
  func.func @transform_0(%arg0: i32, %arg1: i32) -> i32 {
    %c0_i32 = arith.constant 0 : i32
    %c0_i32_0 = arith.constant 0 : i32
    return %c0_i32 : i32
  }
  func.func @transform_1(%arg0: i32, %arg1: i32) -> (i32, i32, i32) {
    %c0_i32 = arith.constant 0 : i32
    %c0_i32_0 = arith.constant 0 : i32
    return %arg0, %c0_i32, %arg1 : i32, i32, i32
  }
  func.func @transform_2(%arg0: i32, %arg1: i32) -> (i32, i32, i32) {
    %c0_i32 = arith.constant 0 : i32
    %c0_i32_0 = arith.constant 0 : i32
    %c0_i32_1 = arith.constant 0 : i32
    return %arg0, %c0_i32, %c0_i32_0 : i32, i32, i32
  }
  func.func @transform_3(%arg0: i32, %arg1: i32) -> (i32, i32, i32, i32) {
    %c0_i32 = arith.constant 0 : i32
    %c0_i32_0 = arith.constant 0 : i32
    %c0_i32_1 = arith.constant 0 : i32
    return %arg0, %c0_i32, %arg1, %c0_i32_0 : i32, i32, i32, i32
  }
  func.func @transform_4(%arg0: i32, %arg1: i32) -> (i32, i32) {
    %c0_i32 = arith.constant 0 : i32
    %c0_i32_0 = arith.constant 0 : i32
    %c0_i32_1 = arith.constant 0 : i32
    return %c0_i32, %c0_i32_0 : i32, i32
  }
  func.func @transform_5(%arg0: i32, %arg1: i32) -> (i32, i32, i32) {
    %c0_i32 = arith.constant 0 : i32
    %c0_i32_0 = arith.constant 0 : i32
    %c0_i32_1 = arith.constant 0 : i32
    return %arg0, %c0_i32, %c0_i32_0 : i32, i32, i32
  }
}

</mosaic_0001>

<bundles_post_ra>
// kernel: tpu_custom_call.1
= control target key start
LH: loop header
LB: loop body
LE: loop exit
PB: predicated region body
PF: predicated region fallthrough
CT: control target
= control target key end

     0   :  { %10 = vsyncpa [#allocation5], 0  ;;  %s1530_s0 = inlined_call_operand.vmem [shape: f32[4], index: 0, kind: input, shape index: {}]   ;;  %s1531_s1 = inlined_call_operand.vmem [shape: s32[2,1,128], index: 1, kind: input, shape index: {}]   ;;  %s1532_s2 = inlined_call_operand.vmem [shape: f32[2,8,1], index: 2, kind: input, shape index: {}]   ;;  %s1533_s3 = inlined_call_operand.vmem [shape: bf16[2,4,128,32], index: 3, kind: input, shape index: {}]   ;;  %s1534_s4 = inlined_call_operand.vmem [shape: f32[32,128], index: 4, kind: input, shape index: {}]   ;;  %s1535_s5 = inlined_call_operand.hbm [shape: f32[2,8,128], index: 5, kind: output, shape index: {}]  }
   0x1   :  { %11 = vsyncpa [#allocation4], 0 }
   0x2   :  { %13 = vsyncpa [#allocation4 + $0x1], 0  ;;  %s1289_s18 = smov 0   ;;  %s1291_s19 = smov 0  }
   0x3   :  { %s1293_s20 = smov 0   ;;  %s1295_s21 = smov 0  }
   0x4   :  { %s1297_s22 = smov 0   ;;  %s1299_s23 = smov 0  }
   0x5 LB: > { %s941_s24 = sadd.s32 4294967295, %s1252_s23   ;;  %s942_s25 = sadd.s32 4294967294, %s1252_s23   ;;  %s1252_s23 = sphi %s1299_s23, %s19_s23   ;;  %s1248_s22 = sphi %s1297_s22, %s1544_s22   ;;  %s1244_s21 = sphi %s1295_s21, %s1543_s21   ;;  %s1240_s20 = sphi %s1293_s20, %s1542_s20   ;;  %s1236_s19 = sphi %s1291_s19, %s1541_s19   ;;  %s1232_s18 = sphi %s1289_s18, %s1540_s18  }
   0x6   : > { %s31_s26 = sadd.s32 1, %s1248_s22  ;;  %s162_s27 = sadd.s32 1, %s1240_s20 }
   0x7   : > { %p33_p0 = scmp.ge.s32.totalorder %s31_s26, 2  ;;  %p172_p1 = scmp.ne.s32.totalorder %s1240_s20, %s1236_s19 }
   0x8   : > { %p173_p2 = scmp.eq.s32.totalorder %s941_s24, 1  ;;  %p178_p3 = scmp.ne.s32.totalorder %s1236_s19, %s1232_s18 }
   0x9   : > { %s1546_s26 = smov (%p33_p0, %s31_s26), 0  ;;  %p179_p5 = scmp.eq.s32.totalorder %s942_s25, 1 }
   0xa   : > { %p1329_p4 = por %p173_p2, %p172_p1  ;;  %s159_s29 = ssub.s32 %s1248_s22, %s1546_s26 }
   0xb   : > { %p943_p6 = scmp.ge.s32.totalorder %s1252_s23, 1  ;;  %p160_p7 = scmp.eq.s32.totalorder %s159_s29, 0 }
   0xc   : > { %p1336_p8 = por %p179_p5, %p178_p3  ;;  %p186_p9 = scmp.lt.s32.totalorder %s1252_s23, 3 }
   0xd   : > { %s1342_s6 = scalar_select %p160_p7, %s1240_s20, %s162_s27  }
   0xe   : > { %p1344_p10 = pnand %p943_p6, %p186_p9  ;;  %p1348_p11 = scmp.eq.s32.totalorder %s941_s24, 0 }
   0xf   : > { %s199_s11 = sshll.u32 %s1530_s0, 4  ;;  %s200_s11 = int_to_ptr.vmem [resolvable:$true] %s199_s11 }
  0x10   : > { %p1061_p12 = pneg %p1344_p10  ;;  %s1157_s12 = scalar_lea.vmem %s200_s11, 16 }
  0x11   : > { %p1158_p0 = scmp.ne.s32.totalorder %s200_s11, %s1157_s12  ;;  %p1165_p5 = scmp.lt.s32.totalorder %s200_s11, %s200_s11 }
  0x12   : > { %p1062_p13 = pnand %p1348_p11, %p1061_p12  ;;  %p1166_p6 = scmp.lt.s32.totalorder %s1157_s12, %s1157_s12 }
  0x14   : > { %p1159_p1 = pneg %p1062_p13  ;;  %p1167_p7 = por %p1166_p6, %p1165_p5 }
  0x16   : > { %p1160_p2 = pnand %p1159_p1, %p1158_p0 }
  0x18   : > { %p1161_p3 = pneg %p1160_p2 }
  0x1a   : > { %p1168_p9 = pnand %p1167_p7, %p1161_p3 }
  0x1c   : > { %1171 = shalt.err (!%p1168_p9)
}
  0x1d   : > { %s1254_s13 = smov [#allocation3]   ;;  %244 = sbr.rel (%p1344_p10) target bundleno = 496 (0x1f0), region = 40 }
  0x1e   : > { %1064 = dma.vmem_to_smem (!%p1062_p13), %s200_s11, 16, %s1254_s13, [#allocation5]  }
  0x22   : > { %1223 = dma.done.wait (%p1348_p11), [#allocation5], 16  }
  0x23   : > { %1225 = vsyncadd (%p1348_p11), [#allocation5], 4294967280 }
  0x24   : > { %250 = sfence }
  0x25   : > { %p287_p12 = scmp.lt.s32.totalorder %s1244_s21, 1  ;;  %v314_v0 = vlaneseq  ;;  %s1366_s14 = sld [smem:[#allocation3 + $0x1]]  ;;  %v1255_v1 = vmov 0   ;;  %v1256_v6 = vmov 0.0   ;;  %vm312_vm1 = vcmask 261120   ;;  %v743_v48 = vld [vmem:[%s1534_s4 + $0x18] sm:$0xff] }
  0x26   : > { %s1368_s15 = sld [smem:[#allocation3 + $0x3]]  ;;  %1124 = vset.pattern.permute.xlu0 %v1255_v1  ;;  %313 = vst.msk [vmem:[#allocation2] sm:$0xff] %vm312_vm1, %v1256_v6  ;;  %v742_v49 = vld [vmem:[%s1534_s4 + $0x10] sm:$0xff]  ;;  %v741_v50 = vld [vmem:[%s1534_s4 + $0x8] sm:$0xff]  ;;  %v740_v51 = vld [vmem:[%s1534_s4] sm:$0xff]  ;;  %vm1257_vm2 = vmmov 0  }
  0x27   : > { %s1371_s16 = scalar_select %p287_p12, %s1244_s21, 1  ;;  %v315_v2 = vshrl.u32 %v314_v0, 7 }
  0x28   : > { %s1373_s17 = sld [smem:[#allocation3]] }
  0x29   : > { %s994_s24 = sshll.u32 %s1371_s16, 8  ;;  %s292_s29 = scalar_lea.vmem %s1531_s1, %s1371_s16 }
  0x2a   : > { %s1383_s9 = scalar_lea.vmem %s1533_s3, %s994_s24  ;;  %v952_v3 = vld [vmem:[%s292_s29] ss:$0 sm:$0xff]  ;;  %s1385_s10 = sld [smem:[#allocation3 + $0x2]] }
  0x2b   : > { %v1125_v4 = vld [vmem:[%s1383_s9 + $0x78] sm:$0xff]   ;;  %vm321_vm0 = vcmp.eq.s32.totalorder %v315_v2, %v952_v3  ;;  %s344_s11 = sshrl.u32 %s1366_s14, 16  ;;  %p343_p10 = scmp.ne.f32.partialorder %s1366_s14, %s1366_s14  ;;  %v1129_v10 = vld [vmem:[%s1383_s9 + $0x70] sm:$0xff]   ;;  %v1133_v14 = vld [vmem:[%s1383_s9 + $0x68] sm:$0xff]  }
  0x2c   : > { %v1126_v5 = vld [vmem:[%s1383_s9 + $0xf8] sm:$0xff]   ;;  %v953_v7 = vsel %vm321_vm0, 1.0, %v1256_v6  ;;  %995 = vmatprep.subr.bf16.mxu0 %v1125_v4  ;;  %s345_s12 = sand.u32 1, %s344_s11  ;;  %s376_s25 = sshrl.u32 %s1368_s15, 16  ;;  %v1130_v11 = vld [vmem:[%s1383_s9 + $0xf0] sm:$0xff]   ;;  %v1134_v16 = vld [vmem:[%s1383_s9 + $0xe8] sm:$0xff]  }
  0x2d   : > { %v1127_v8 = vld [vmem:[%s1383_s9 + $0x38] sm:$0xff]   ;;  %1017 = vmatprep.subr.bf16.mxu1 %v1126_v5  ;;  %s346_s13 = sadd.s32 32767, %s345_s12  ;;  %v1131_v12 = vld [vmem:[%s1383_s9 + $0x30] sm:$0xff]   ;;  %s377_s29 = sand.u32 1, %s376_s25  ;;  %v1405_v15 = vpack.c.bf16 %v953_v7, %v953_v7  ;;  %v1135_v17 = vld [vmem:[%s1383_s9 + $0x28] sm:$0xff]  }
  0x2e   : > { %v1128_v9 = vld [vmem:[%s1383_s9 + $0xb8] sm:$0xff]   ;;  %996 = vmatpush3.bf16.msra.mxu0 %v1127_v8  ;;  %s347_s24 = sadd.s32 %s1366_s14, %s346_s13  ;;  %v1132_v13 = vld [vmem:[%s1383_s9 + $0xb0] sm:$0xff]   ;;  %p375_p11 = scmp.ne.f32.partialorder %s1368_s15, %s1368_s15  ;;  %v1136_v18 = vld [vmem:[%s1383_s9 + $0xa8] sm:$0xff]  }
  0x2f   : > { %1018 = vmatpush3.bf16.msra.mxu1 %v1128_v9  ;;  %s348_s27 = sand.u32 4294901760, %s347_s24  ;;  %997 = vmatprep.subr.bf16.mxu0 %v1129_v10  ;;  %s378_s11 = sadd.s32 32767, %s377_s29  ;;  %v1137_v20 = vld [vmem:[%s1383_s9 + $0x60] sm:$0xff]   ;;  %v1141_v25 = vld [vmem:[%s1383_s9 + $0x58] sm:$0xff]   ;;  %v1145_v31 = vld [vmem:[%s1383_s9 + $0x50] sm:$0xff]  }
  0x30   : > { %s1548_s27 = smov (%p343_p10, %s348_s27), 2143289344  ;;  %1019 = vmatprep.subr.bf16.mxu1 %v1130_v11  ;;  %s379_s12 = sadd.s32 %s1368_s15, %s378_s11  ;;  %v1138_v22 = vld [vmem:[%s1383_s9 + $0xe0] sm:$0xff]   ;;  %v1142_v26 = vld [vmem:[%s1383_s9 + $0xd8] sm:$0xff]   ;;  %v1146_v32 = vld [vmem:[%s1383_s9 + $0xd0] sm:$0xff]  }
  0x31   : > { %s351_s7 = sshrl.u32 %s1548_s27, 16  ;;  %s328_s13 = sshrl.u32 %s1373_s17, 16  ;;  %v1139_v23 = vld [vmem:[%s1383_s9 + $0x20] sm:$0xff]   ;;  %v1143_v27 = vld [vmem:[%s1383_s9 + $0x18] sm:$0xff]   ;;  %v1147_v33 = vld [vmem:[%s1383_s9 + $0x10] sm:$0xff]  }
  0x32   : > { %998 = vmatpush3.bf16.msra.mxu0 %v1131_v12  ;;  %s352_s8 = sshll.u32 %s351_s7, 16  ;;  %s380_s24 = sand.u32 4294901760, %s379_s12  ;;  %v1140_v24 = vld [vmem:[%s1383_s9 + $0xa0] sm:$0xff]   ;;  %v1144_v29 = vld [vmem:[%s1383_s9 + $0x98] sm:$0xff]   ;;  %v1148_v34 = vld [vmem:[%s1383_s9 + $0x90] sm:$0xff]  }
  0x33   : > { %1020 = vmatpush3.bf16.msra.mxu1 %v1132_v13  ;;  %999 = vmatprep.subr.bf16.mxu0 %v1133_v14  ;;  %s353_s14 = sor.u32 %s352_s8, %s351_s7  ;;  %s1550_s24 = smov (%p375_p11, %s380_s24), 2143289344  ;;  %v1149_v35 = vld [vmem:[%s1383_s9 + $0x48] sm:$0xff]   ;;  %v1153_v39 = vld [vmem:[%s1383_s9 + $0x40] sm:$0xff]  }
  0x34   : > { %1021 = vmatprep.subr.bf16.mxu1 %v1134_v16  ;;  %v354_v19 = vstv %s353_s14  ;;  %s329_s25 = sand.u32 1, %s328_s13  ;;  %s383_s27 = sshrl.u32 %s1550_s24, 16  ;;  %v1150_v36 = vld [vmem:[%s1383_s9 + $0xc8] sm:$0xff]   ;;  %v1154_v41 = vld [vmem:[%s1383_s9 + $0xc0] sm:$0xff]  }
  0x35   : > { %v356_v21 = vmul.bf16 %v354_v19, %v1405_v15  ;;  %s384_s29 = sshll.u32 %s383_s27, 16  ;;  %p327_p13 = scmp.ne.f32.partialorder %s1373_s17, %s1373_s17  ;;  %v1151_v37 = vld [vmem:[%s1383_s9 + $0x8] sm:$0xff]   ;;  %v1155_v42 = vld [vmem:[%s1383_s9] sm:$0xff]  }
  0x36   : > { %1000 = vmatpush3.bf16.msra.mxu0 %v1135_v17  ;;  %s385_s15 = sor.u32 %s384_s29, %s383_s27  ;;  %s330_s7 = sadd.s32 32767, %s329_s25  ;;  %v1152_v38 = vld [vmem:[%s1383_s9 + $0x88] sm:$0xff]   ;;  %v1156_v43 = vld [vmem:[%s1383_s9 + $0x80] sm:$0xff]  }
  0x37   : > { %1022 = vmatpush3.bf16.msra.mxu1 %v1136_v18  ;;  %1001 = vmatprep.subr.bf16.mxu0 %v1137_v20  ;;  %v386_v28 = vstv %s385_s15  ;;  %s331_s8 = sadd.s32 %s330_s7, %s1373_s17  ;;  %s360_s14 = sshrl.u32 %s1385_s10, 16  ;;  %v453_v59 = vld [vmem:[#allocation2] sm:$0xff] }
  0x38   : > { %678 = vmatprep.mubr.bf16.mxu0 %v356_v21  ;;  %1023 = vmatprep.subr.bf16.mxu1 %v1138_v22  ;;  %v388_v30 = vmul.bf16 %v386_v28, %v1405_v15  ;;  %s332_s11 = sand.u32 4294901760, %s331_s8  ;;  %s361_s12 = sand.u32 1, %s360_s14 }
  0x39   : > { %s1552_s11 = smov (%p327_p13, %s332_s11), 2143289344  ;;  %p359_p0 = scmp.ne.f32.partialorder %s1385_s10, %s1385_s10 }
  0x3a   : > { %1002 = vmatpush3.bf16.msra.mxu0 %v1139_v23  ;;  %718 = vmatprep.mubr.bf16.mxu1 %v388_v30  ;;  %s335_s13 = sshrl.u32 %s1552_s11, 16  ;;  %s362_s25 = sadd.s32 32767, %s361_s12 }
  0x3b   : > { %1024 = vmatpush3.bf16.msra.mxu1 %v1140_v24  ;;  %1003 = vmatprep.subr.bf16.mxu0 %v1141_v25  ;;  %s336_s24 = sshll.u32 %s335_s13, 16  ;;  %s363_s27 = sadd.s32 %s1385_s10, %s362_s25 }
  0x3c   : > { %1025 = vmatprep.subr.bf16.mxu1 %v1142_v26  ;;  %s337_s17 = sor.u32 %s336_s24, %s335_s13  ;;  %s949_s29 = sshll.u32 %s1371_s16, 3 }
  0x3d   : > { %s364_s15 = sand.u32 4294901760, %s363_s27  ;;  %v338_v40 = vstv %s337_s17  ;;  %s296_s11 = scalar_lea.vmem %s1532_s2, %s949_s29 }
  0x3e   : > { %1004 = vmatpush3.bf16.msra.mxu0 %v1143_v27  ;;  %s1554_s15 = smov (%p359_p0, %s364_s15), 2143289344  ;;  %v340_v44 = vmul.bf16 %v338_v40, %v1405_v15  ;;  %v733_v46 = vld [vmem:[%s296_s11] sm:$0xff]  ;;  %s991_s11 = sshll.u32 %s1244_s21, 7 }
  0x3f   : > { %1026 = vmatpush3.bf16.msra.mxu1 %v1144_v29  ;;  %1005 = vmatprep.subr.bf16.mxu0 %v1145_v31  ;;  %s367_s7 = sshrl.u32 %s1554_s15, 16  ;;  %s284_s15 = sand.u32 1, %s1236_s19  }
  0x40   : > { %1027 = vmatprep.subr.bf16.mxu1 %v1146_v32  ;;  %s368_s16 = sshll.u32 %s367_s7, 16  ;;  %736 = vperm.xlu0 %1124, %v733_v46   ;;  %s1486_s10 = scalar_lea.hbm %s1535_s5, %s991_s11 }
  0x41   : > { %s369_s12 = sor.u32 %s368_s16, %s367_s7  ;;  %s948_s7 = sshll.u32 %s284_s15, 3 }
  0x42   : > { %1006 = vmatpush3.bf16.msra.mxu0 %v1147_v33  ;;  %v370_v45 = vstv %s369_s12  ;;  %s286_s8 = scalar_lea.vmem [#allocation6], %s948_s7  ;;  %s819_s9 = scalar_lea.sflag [#allocation4], %s284_s15 }
  0x43   : > { %1028 = vmatpush3.bf16.msra.mxu1 %v1148_v34  ;;  %1007 = vmatprep.subr.bf16.mxu0 %v1149_v35  ;;  %v372_v47 = vmul.bf16 %v370_v45, %v1405_v15  ;;  %s832_s14 = sshll.u32 %s286_s8, 4  ;;  %s1258_s21 = smov [#allocation6]   ;;  %s1481_s14 = int_to_ptr.vmem [resolvable:$true] %s832_s14 }
  0x44   : > { %1029 = vmatprep.subr.bf16.mxu1 %v1150_v36  ;;  %s1172_s13 = scalar_lea.vmem %s1481_s14, 128  ;;  %s1176_s24 = sshll.u32 %s1258_s21, 4  ;;  %s1177_s24 = int_to_ptr.vmem [resolvable:$false] %s1176_s24 }
  0x45   : > { %p1173_p1 = scmp.ne.s32.totalorder %s1481_s14, %s1172_s13  ;;  %s1178_s17 = scalar_lea.vmem %s1177_s24, 256 }
  0x46   : > { %1008 = vmatpush3.bf16.msra.mxu0 %v1151_v37  ;;  %p1179_p5 = scmp.lt.s32.totalorder %s1481_s14, %s1177_s24  ;;  %p1180_p6 = scmp.lt.s32.totalorder %s1178_s17, %s1172_s13 }
  0x47   : > { %1030 = vmatpush3.bf16.msra.mxu1 %v1152_v38  ;;  %1009 = vmatprep.subr.bf16.mxu0 %v1153_v39  ;;  %p1174_p2 = pnand %p1173_p1, %p1329_p4 }
  0x48   : > { %1031 = vmatprep.subr.bf16.mxu1 %v1154_v41  ;;  %p1181_p7 = por %p1180_p6, %p1179_p5 }
  0x49   : > { %p1175_p3 = pneg %p1174_p2 }
  0x4a   : > { %1010 = vmatpush3.bf16.msra.mxu0 %v1155_v42 }
  0x4b   : > { %1032 = vmatpush3.bf16.msra.mxu1 %v1156_v43  ;;  %1044 = vmatprep.subr.mxu0 %v1256_v6  ;;  %p1182_p9 = pnand %p1181_p7, %p1175_p3 }
  0x4d   : > { %679 = vmatmul.mubr.bf16.vlgmr.msra.gmra.mxu0 %v340_v44 }
  0x4e   : > { %719 = vmatmul.mubr.bf16.vlgmr.msra.gmra.mxu1 %v372_v47  ;;  %1045 = vmatpush3.msra.mxu0 %v743_v48 }
  0x4f   : > { %1046 = vmatprep.subr.mxu0 %v1256_v6  ;;  %1052 = vmatprep.mubr.msk.f32.mxu0 %vm1257_vm2, %v1256_v6 }
  0x50   : > { %1047 = vmatpush3.msra.mxu0 %v742_v49 }
  0x51   : > { %1048 = vmatprep.subr.mxu0 %v1256_v6 }
  0x52   : > { %1049 = vmatpush3.msra.mxu0 %v741_v50 }
  0x53   : > { %1050 = vmatprep.subr.mxu0 %v1256_v6 }
  0x54   : > { %1051 = vmatpush3.msra.mxu0 %v740_v51 }
  0xbb   : > { %v737_v1 = vpop.permute.xlu0 %736 }
 0x10d   : > { %v1011_v52 = vpop.f32.mrf.mxu0 }
 0x10e   : > { %v1033_v53 = vpop.f32.mrf.mxu1 }
 0x10f   : > { %v1012_v54 = vpop.f32.mrf.mxu0 }
 0x110   : > { %v1013_v55 = vadd.f32 %v1012_v54, %v1011_v52  ;;  %v1034_v56 = vpop.f32.mrf.mxu1 }
 0x111   : > { %v1035_v57 = vadd.f32 %v1034_v56, %v1033_v53  ;;  %v1014_v58 = vpop.f32.mrf.mxu0 }
 0x112   : > { %v1036_v60 = vpop.f32.mrf.mxu1 }
 0x113   : > { %v721_v61 = vadd.f32 %v1035_v57, %v1013_v55  ;;  %v1015_v62 = vpop.f32.mrf.mxu0 }
 0x114   : > { %v1037_v63 = vpop.f32.mrf.mxu1 }
 0x115   : > { %v726_v0 = vadd.f32 %v721_v61, %v453_v59 }
 0x117   : > { %728 = vst.msk [vmem:[#allocation2] sm:$0xff] %vm312_vm1, %v726_v0 }
 0x11e   : > { %v732_v2 = vld [vmem:[#allocation2] sm:$0xff] }
 0x11f   : > { %v739_v3 = vmul.f32 %v737_v1, %v732_v2 }
 0x121   : > { %1053 = vmatmul.mubr.msk.f32.vlgmr.msra.gmra.mxu0 %vm312_vm1, %v739_v3 }
 0x1e1   : > { %v813_v4 = vpop.f32.mrf.mxu0 }
 0x1e2   : > { %817 = vst [vmem:[%s286_s8] sm:$0xff] %v813_v4 }
 0x1e3   : > { %v1054_v5 = vpop.f32.mrf.mxu0 }
 0x1e4   : > { %1185 = shalt.err (!%p1182_p9)
}
 0x1e5   : > { %s1186_s25 = scalar_lea.hbm %s1486_s10, 128  ;;  %s1190_s15 = scalar_lea.hbm %s1535_s5, 256 }
 0x1e6   : > { %p1187_p12 = scmp.ne.s32.totalorder %s1486_s10, %s1186_s25  ;;  %p1191_p13 = scmp.lt.s32.totalorder %s1486_s10, %s1535_s5 }
 0x1e7   : > { %p1192_p0 = scmp.lt.s32.totalorder %s1190_s15, %s1186_s25 }
 0x1e8   : > { %p1188_p10 = pnand %p1187_p12, %p1329_p4 }
 0x1e9   : > { %p1193_p1 = por %p1192_p0, %p1191_p13 }
 0x1ea   : > { %p1189_p11 = pneg %p1188_p10 }
 0x1ec   : > { %p1194_p2 = pnand %p1193_p1, %p1189_p11 }
 0x1ee   : > { %1197 = shalt.err (!%p1194_p2)
}
 0x1ef   : > { %1059 = dma.vmem_to_hbm [thread:$0]  (%p1329_p4), %s1481_s14, 128, %s1486_s10, %s819_s9  }
 0x1f0 PF: > { %p1071_p3 = scmp.ge.s32.totalorder %s1252_s23, 2  ;;  %s844_s11 = sand.u32 1, %s1232_s18  }
 0x1f1   : > { %s845_s16 = scalar_lea.sflag [#allocation4], %s844_s11 }
 0x1f2   : > { %p1066_p5 = pnand %p1071_p3, %p1336_p8 }
 0x1f4   : > { %p1067_p6 = pneg %p1066_p5 }
 0x1f6   : > { %1227 = dma.done.wait (%p1067_p6), %s845_s16, 128  }
 0x1f7   : > { %1229 = vsyncadd (%p1067_p6), %s845_s16, 4294967168  ;;  %s19_s23 = sadd.s32 1, %s1252_s23   ;;  %s1540_s18 = smov %s1236_s19 }
 0x1f8   : > { %p16_p7 = scmp.ge.s32.totalorder %s19_s23, 4   ;;  %s1541_s19 = smov %s1240_s20 }
 0x1f9   : > { %s1542_s20 = smov %s1342_s6  ;;  %s1543_s21 = smov %s1248_s22 }
 0x1fa   : > { %s1544_s22 = smov %s1546_s26  ;;  %18 = sbr.rel (!%p16_p7) target bundleno = 5 (0x5), region = 94 }
 0x1ff   :  { %850 = vsyncpa [#allocation4], 1 }
 0x200   :  { %852 = vsyncpa [#allocation4 + $0x1], 1 }
 0x201   :  { %853 = vsyncpa [#allocation5], 1 }
 0x202   :  { %855 = vsyncpa [#allocation5 + $0x1], 1 }

</bundles_post_ra>
